<compile_context>
chip_gen: v7x
topology: tpu7x:2x2x1
jax: 0.10.0
libtpu: 0.0.40
codegen_flags: <defaults>
</compile_context>

<pallas_src>
import functools

import jax
import jax.numpy as jnp
from jax.experimental import pallas as pl
from jax.experimental.pallas import tpu as pltpu


# ----------------------------- config -----------------------------
class Cfg:
    d_vocab = 128
    d_model = 32
    init_range = 0.02


# ----------------------------- kernel -----------------------------
def embed_kernel(tok_ref, we_ref, out_ref, *, d_vocab):
    """Embedding gather as a one-hot matmul.

    tok_ref : (N, 1) int32 in VMEM  -- flattened token ids
    we_ref  : (V, D) f32  in VMEM   -- embedding table
    out_ref : (N, D) f32  in VMEM   -- gathered embeddings
    """
    toks = tok_ref[...]                                          # (N, 1)
    n = toks.shape[0]

    # one_hot[i, v] = (v == toks[i]); 0/1 are exact, so the matmul reproduces
    # the row gather bit-for-bit (single nonzero term per output element).
    col = jax.lax.broadcasted_iota(jnp.int32, (n, d_vocab), 1)   # (N, V)
    onehot = (col == toks).astype(we_ref.dtype)                  # (N, V)

    out_ref[...] = jnp.dot(
        onehot, we_ref[...], preferred_element_type=jnp.float32
    ).astype(out_ref.dtype)


# ----------------------------- wrapper -----------------------------
def embed_forward(tokens, w_e):
    B, S = tokens.shape
    V, D = w_e.shape
    N = B * S
    tok2d = tokens.reshape(N, 1).astype(jnp.int32)

    kernel = functools.partial(embed_kernel, d_vocab=V)

    out = pl.pallas_call(
        kernel,
        out_shape=jax.ShapeDtypeStruct((N, D), w_e.dtype),
        grid_spec=pltpu.PrefetchScalarGridSpec(
            num_scalar_prefetch=0,
            grid=(1,),  # single step: the whole problem fits in VMEM easily
            in_specs=[
                pl.BlockSpec((N, 1), lambda i: (0, 0)),   # full array -> no (8,128) constraint
                pl.BlockSpec((V, D), lambda i: (0, 0)),
            ],
            out_specs=pl.BlockSpec((N, D), lambda i: (0, 0)),
        ),
        compiler_params=pltpu.CompilerParams(
            dimension_semantics=("arbitrary",)),
    )(tok2d, w_e)

    return out.reshape(B, S, D)


# ----------------------------- pure-JAX reference -----------------------------
def embed_reference(tokens, w_e):
    return w_e[tokens, :]


# ----------------------------- main -----------------------------
if __name__ == "__main__":
    cfg = Cfg()
    B, S = 2, 8

    key = jax.random.PRNGKey(0)
    k_we, k_tok = jax.random.split(key)

    w_e = (cfg.init_range
           * jax.random.normal(k_we, (cfg.d_vocab, cfg.d_model))).astype(jnp.float32)
    tokens = jax.random.randint(k_tok, (B, S), 0, cfg.d_vocab, dtype=jnp.int32)

    out = embed_forward(tokens, w_e)
    out = jax.block_until_ready(out)

    ref = embed_reference(tokens, w_e)
    assert out.shape == (B, S, cfg.d_model)
    assert jnp.allclose(out, ref, atol=1e-6, rtol=1e-6), \
        f"max abs err = {jnp.max(jnp.abs(out - ref))}"

    print("KERNEL_OK")
</pallas_src>

<mosaic_0001>
module attributes {stable_mosaic.version = 11 : i64} {
  func.func @embed_kernel(%arg0: i32, %arg1: memref<16x1xi32, #tpu.memory_space<vmem>>, %arg2: memref<128x32xf32, #tpu.memory_space<vmem>>, %arg3: memref<16x32xf32, #tpu.memory_space<vmem>>) attributes {dimension_semantics = [#tpu.dimension_semantics<arbitrary>], iteration_bounds = array<i64: 1>, scalar_prefetch = 0 : i64, scratch_operands = 0 : i64, tpu.core_type = #tpu.core_type<tc>, window_params = [{pipeline_mode = #tpu.pipeline_mode<synchronous>, transform_indices = @transform_0, window_bounds = array<i64: 16, 1>}, {pipeline_mode = #tpu.pipeline_mode<synchronous>, transform_indices = @transform_1, window_bounds = array<i64: 128, 32>}, {pipeline_mode = #tpu.pipeline_mode<synchronous>, transform_indices = @transform_2, window_bounds = array<i64: 16, 32>}]} {
    %c0 = arith.constant 0 : index
    %c0_0 = arith.constant 0 : index
    %0 = vector.load %arg1[%c0, %c0_0] : memref<16x1xi32, #tpu.memory_space<vmem>>, vector<16x1xi32>
    %1 = tpu.iota {dimensions = array<i32: 1>} : vector<16x128xi32>
    %2 = vector.broadcast %0 : vector<16x1xi32> to vector<16x128xi32>
    %3 = arith.cmpi eq, %1, %2 : vector<16x128xi32>
    %4 = arith.extui %3 : vector<16x128xi1> to vector<16x128xi32>
    %5 = arith.sitofp %4 : vector<16x128xi32> to vector<16x128xf32>
    %c0_1 = arith.constant 0 : index
    %c0_2 = arith.constant 0 : index
    %6 = vector.load %arg2[%c0_1, %c0_2] : memref<128x32xf32, #tpu.memory_space<vmem>>, vector<128x32xf32>
    %cst = arith.constant dense<0.000000e+00> : vector<16x32xf32>
    %7 = tpu.matmul %5, %6, %cst {dimension_numbers = #tpu.dot_dimension_numbers<[1], [0], [0], [1], [0, 0, 1, 1], [], []>} : vector<16x128xf32>, vector<128x32xf32>, vector<16x32xf32> -> vector<16x32xf32>
    %c0_3 = arith.constant 0 : index
    %c0_4 = arith.constant 0 : index
    %8 = vector.load %arg3[%c0_3, %c0_4] : memref<16x32xf32, #tpu.memory_space<vmem>>, vector<16x32xf32>
    tpu.vector_store %arg3[%c0_3, %c0_4], %7 {strides = array<i32>} : memref<16x32xf32, #tpu.memory_space<vmem>>, vector<16x32xf32>,
    return
  }
  func.func @transform_0(%arg0: i32) -> (i32, i32) {
    %c0_i32 = arith.constant 0 : i32
    %c0_i32_0 = arith.constant 0 : i32
    %c0_i32_1 = arith.constant 0 : i32
    return %c0_i32, %c0_i32_0 : i32, i32
  }
  func.func @transform_1(%arg0: i32) -> (i32, i32) {
    %c0_i32 = arith.constant 0 : i32
    %c0_i32_0 = arith.constant 0 : i32
    %c0_i32_1 = arith.constant 0 : i32
    return %c0_i32, %c0_i32_0 : i32, i32
  }
  func.func @transform_2(%arg0: i32) -> (i32, i32) {
    %c0_i32 = arith.constant 0 : i32
    %c0_i32_0 = arith.constant 0 : i32
    %c0_i32_1 = arith.constant 0 : i32
    return %c0_i32, %c0_i32_0 : i32, i32
  }
}

</mosaic_0001>

<bundles_post_ra>
// kernel: tpu_custom_call.1
= control target key start
LH: loop header
LB: loop body
LE: loop exit
PB: predicated region body
PF: predicated region fallthrough
CT: control target
= control target key end

     0   :  { %v257_v2 = vmov 0   ;;  %s343_s0 = inlined_call_operand.vmem [shape: s32[16,1], index: 0, kind: input, shape index: {}]   ;;  %s344_s1 = inlined_call_operand.vmem [shape: f32[128,32], index: 1, kind: input, shape index: {}]   ;;  %s345_s2 = inlined_call_operand.hbm [shape: f32[16,32], index: 2, kind: output, shape index: {}]  }
   0x1   :  { %v12_v0 = vld [vmem:[%s343_s0] sm:$0xff]  ;;  %232 = vset.pattern.permute.xlu0 %v257_v2  ;;  %v29_v3 = vld [vmem:[%s344_s1 + $0x8] sm:$0xff]  ;;  %v30_v4 = vld [vmem:[%s344_s1 + $0x10] sm:$0xff] }
   0x2   :  { %v28_v1 = vld [vmem:[%s344_s1] sm:$0xff]  ;;  %v31_v5 = vld [vmem:[%s344_s1 + $0x18] sm:$0xff]  ;;  %17 = vperm.xlu0 %232, %v12_v0   ;;  %v13_v8 = vld [vmem:[%s343_s0 + $0x8] sm:$0xff] }
   0x3   :  { %v195_v6 = vpack.c.bf16 %v29_v3, %v28_v1  ;;  %v199_v7 = vpack.c.bf16 %v31_v5, %v30_v4  ;;  %v32_v9 = vld [vmem:[%s344_s1 + $0x20] sm:$0xff]  ;;  %v33_v10 = vld [vmem:[%s344_s1 + $0x28] sm:$0xff] }
   0x4   :  { %v203_v11 = vpack.c.bf16 %v33_v10, %v32_v9 }
   0x5   :  { %196 = vmatprep.subr.bf16.mxu0 %v195_v6 }
   0x6   :  { %198 = vmatpush3.bf16.msra.mxu0 %v195_v6  ;;  %20 = vperm.xlu0 %232, %v13_v8  }
   0x7   :  { %200 = vmatprep.subr.bf16.mxu0 %v199_v7 }
   0x8   :  { %7 = vsyncpa [#allocation3], 0  ;;  %v34_v12 = vld [vmem:[%s344_s1 + $0x30] sm:$0xff]  ;;  %v35_v13 = vld [vmem:[%s344_s1 + $0x38] sm:$0xff]  ;;  %v14_v27 = vlaneseq  ;;  %v258_v30 = vmov 1.0   ;;  %s259_s16 = smov [#allocation2]  }
   0x9   :  { %v207_v14 = vpack.c.bf16 %v35_v13, %v34_v12  ;;  %v36_v15 = vld [vmem:[%s344_s1 + $0x40] sm:$0xff]  ;;  %v37_v16 = vld [vmem:[%s344_s1 + $0x48] sm:$0xff]  ;;  %v38_v18 = vld [vmem:[%s344_s1 + $0x50] sm:$0xff]  ;;  %s127_s17 = sshll.u32 %s259_s16, 4  ;;  %vm119_vm2 = vcmask 261120   ;;  %s128_s17 = int_to_ptr.vmem [resolvable:$true] %s127_s17 }
   0xa   :  { %202 = vmatpush3.bf16.msra.mxu0 %v199_v7  ;;  %v211_v17 = vpack.c.bf16 %v37_v16, %v36_v15  ;;  %v39_v19 = vld [vmem:[%s344_s1 + $0x58] sm:$0xff]  ;;  %v40_v21 = vld [vmem:[%s344_s1 + $0x60] sm:$0xff]  ;;  %v41_v22 = vld [vmem:[%s344_s1 + $0x68] sm:$0xff]  ;;  %v15_v28 = vand.u32 127, %v14_v27  ;;  %p238_p1 = scmp.lt.s32.totalorder %s128_s17, %s128_s17 }
   0xb   :  { %204 = vmatprep.subr.bf16.mxu0 %v203_v11  ;;  %v215_v20 = vpack.c.bf16 %v39_v19, %v38_v18  ;;  %v219_v23 = vpack.c.bf16 %v41_v22, %v40_v21  ;;  %v42_v24 = vld [vmem:[%s344_s1 + $0x70] sm:$0xff]  ;;  %v43_v25 = vld [vmem:[%s344_s1 + $0x78] sm:$0xff]  ;;  %s233_s1 = scalar_lea.vmem %s128_s17, 256 }
   0xc   :  { %v223_v26 = vpack.c.bf16 %v43_v25, %v42_v24  ;;  %p234_p0 = scmp.ne.s32.totalorder %s128_s17, %s233_s1  ;;  %p239_p2 = scmp.lt.s32.totalorder %s233_s1, %s233_s1 }
   0xe   :  { %206 = vmatpush3.bf16.msra.mxu0 %v203_v11  ;;  %p240_p3 = por %p239_p2, %p238_p1 }
   0xf   :  { %208 = vmatprep.subr.bf16.mxu0 %v207_v14 }
  0x10   :  { %p241_p4 = pnand %p240_p3, %p234_p0 }
  0x12   :  { %210 = vmatpush3.bf16.msra.mxu0 %v207_v14 }
  0x13   :  { %212 = vmatprep.subr.bf16.mxu0 %v211_v17 }
  0x16   :  { %214 = vmatpush3.bf16.msra.mxu0 %v211_v17 }
  0x17   :  { %216 = vmatprep.subr.bf16.mxu0 %v215_v20 }
  0x1a   :  { %218 = vmatpush3.bf16.msra.mxu0 %v215_v20 }
  0x1b   :  { %220 = vmatprep.subr.bf16.mxu0 %v219_v23 }
  0x1e   :  { %222 = vmatpush3.bf16.msra.mxu0 %v219_v23 }
  0x1f   :  { %224 = vmatprep.subr.bf16.mxu0 %v223_v26 }
  0x22   :  { %226 = vmatpush3.bf16.msra.mxu0 %v223_v26 }
  0x81   :  { %v18_v29 = vpop.permute.xlu0 %17 }
  0x82   :  { %vm22_vm0 = vcmp.eq.s32.totalorder %v15_v28, %v18_v29 }
  0x83   :  { %192 = vmatprep.mubr.msk.f32.mxu0 %vm22_vm0, %v258_v30 }
  0x85   :  { %v21_v31 = vpop.permute.xlu0 %20 }
  0x86   :  { %vm23_vm1 = vcmp.eq.s32.totalorder %v15_v28, %v21_v31 }
  0x87   :  { %193 = vmatmul.mubr.msk.f32.vlgmr.msra.gmra.mrb[0].mxu0 %vm23_vm1, %v258_v30 }
 0x15a   :  { %v194_v32 = vpop.f32.mrb[0].mxu0 }
 0x15b   :  { %121 = vst.msk [vmem:[#allocation2 + $0x8] sm:$0xff] %vm119_vm2, %v194_v32  ;;  %v110_v33 = vpop.f32.mrb[1].mxu0 }
 0x15c   :  { %120 = vst.msk [vmem:[#allocation2] sm:$0xff] %vm119_vm2, %v110_v33 }
 0x15d   :  { %244 = shalt.err (!%p241_p4)
}
 0x15e   :  { %s245_s20 = scalar_lea.hbm %s345_s2, 256 }
 0x15f   :  { %p246_p5 = scmp.ne.s32.totalorder %s345_s2, %s245_s20  ;;  %p249_p6 = scmp.lt.u32.totalorder %s245_s20, %s345_s2 }
 0x161   :  { %p251_p7 = pnand %p249_p6, %p246_p5 }
 0x163   :  { %254 = shalt.err (!%p251_p7)
}
 0x164   :  { %s260_s25 = smov 128   ;;  %s261_s26 = smov 8  }
 0x165   :  { %133 = dma.vmem_to_hbm [thread:$0]  %s128_s17, 256, %s345_s2, [#allocation3], %s260_s25, %s260_s25, %s261_s26  }
 0x166   :  { %255 = dma.done.wait [#allocation3], 256  }
 0x167   :  { %256 = vsyncadd [#allocation3], 4294967040 }
 0x168   :  { %137 = vsyncpa [#allocation3], 1 }

</bundles_post_ra>
